<compile_context>
chip_gen: v6e
topology: v6e:2x2x1
jax: 0.10.0
libtpu: 0.0.40
codegen_flags: <defaults>
</compile_context>

<pallas_src>
import functools

import jax
import jax.numpy as jnp
from jax.experimental import pallas as pl
from jax.experimental.pallas import tpu as pltpu


def _dropout_kernel(x_ref, bits_ref, o_ref, *, threshold: int, scale: float):
    """Elementwise dropout on one (tile_rows, cols) block.

    keep an element iff its uniform uint32 >= threshold (= p * 2^32), so
    P(keep) = 1 - p (bias < 2^-32 for p extremely close to 1).
    """
    x = x_ref[...]
    keep = bits_ref[...] >= jnp.asarray(threshold, dtype=jnp.uint32)
    # Fold the rescale into the select: one select + one multiply per vreg,
    # all in the native input dtype (no f32 upcast).
    mult = jnp.where(keep,
                     jnp.asarray(scale, dtype=x.dtype),
                     jnp.asarray(0, dtype=x.dtype))
    o_ref[...] = x * mult


def _lane_dense_2d(x: jax.Array) -> jax.Array:
    """Reshape x to a lane-dense (rows, cols) slab (cols multiple of 128 if possible)."""
    total = x.size
    last = x.shape[-1] if x.ndim >= 1 else 1
    if last > 0 and last % 128 == 0:
        cols = last
    elif total % 128 == 0:
        cols = 128                       # re-pack narrow trailing dims lane-dense
    else:
        cols = max(last, 1)              # fallback: correct, just masked stores
    return x.reshape(total // cols, cols)


def _choose_tile_rows(rows: int, cols: int, itemsize: int) -> int:
    # Per-operand buffer budget ~1.5 MiB: with double-buffered x / bits / out this
    # is ~9 MiB of VMEM -- under v5e's 16 MiB scoped default and comfortable on
    # v7x's smaller physical VMEM, while large enough to sit near the HBM roofline.
    budget_bytes = 3 * 512 * 1024
    bytes_per_row = cols * max(int(itemsize), 4)   # u32 bits dominate for <= f32
    t = max(8, (budget_bytes // bytes_per_row) // 8 * 8)
    t = min(t, 1024)
    return rows if rows <= t else t


def dropout_forward(x: jax.Array, p: float = 0.0, *, seed: int = 0,
                    training: bool = True) -> jax.Array:
    """Pallas equivalent of DropoutLayer(p).forward(x)."""
    p = float(p)
    if not (0.0 <= p < 1.0):
        raise ValueError(f"dropout p must be in [0, 1), got {p}")
    # Eval mode and p == 0 are exact identities -> skip the kernel entirely.
    if not training or p == 0.0:
        return x

    orig_shape = x.shape
    x2 = _lane_dense_2d(x)
    rows, cols = x2.shape
    tile_rows = _choose_tile_rows(rows, cols, jnp.dtype(x.dtype).itemsize)
    grid = (pl.cdiv(rows, tile_rows),)

    # Independent uniform uint32 per element (no per-block seed reuse / correlation).
    bits = jax.random.bits(jax.random.PRNGKey(seed), x2.shape, dtype=jnp.uint32)

    threshold = min(int(round(p * 4294967296.0)), 4294967295)
    scale = 1.0 / (1.0 - p)

    kernel = functools.partial(_dropout_kernel, threshold=threshold, scale=scale)
    block = pl.BlockSpec((tile_rows, cols), lambda i: (i, 0))

    y2 = pl.pallas_call(
        kernel,
        out_shape=jax.ShapeDtypeStruct(x2.shape, x2.dtype),
        grid=grid,
        in_specs=[block, block],
        out_specs=block,
        compiler_params=pltpu.CompilerParams(
            dimension_semantics=("parallel",)),
    )(x2, bits)
    return y2.reshape(orig_shape)


if __name__ == "__main__":
    key = jax.random.PRNGKey(0)
    batch, hidden = 8, 128
    x = jax.random.normal(key, (batch, hidden), dtype=jnp.float32)

    # Module default DropoutLayer(input_dim=hidden, p=0.0) -> identity (no kernel).
    y_id = dropout_forward(x, p=0.0, seed=0)
    jax.block_until_ready(y_id)
    assert y_id.shape == x.shape and y_id.dtype == x.dtype
    assert jnp.allclose(y_id, x), "p=0 dropout must be identity"

    # Eval mode is identity regardless of p (wrapper bypass).
    y_eval = dropout_forward(x, p=0.5, seed=7, training=False)
    jax.block_until_ready(y_eval)
    assert jnp.allclose(y_eval, x)

    # Training-mode dropout, p=0.5: survivors scaled by 1/(1-p), dropped are 0.
    p = 0.5
    y_dp = dropout_forward(x, p=p, seed=1234)
    jax.block_until_ready(y_dp)
    mask = y_dp != 0.0
    assert jnp.allclose(jnp.where(mask, y_dp, 0.0),
                        jnp.where(mask, x / (1.0 - p), 0.0), atol=1e-5)
    keep_frac = float(jnp.mean(mask.astype(jnp.float32)))
    assert 0.3 < keep_frac < 0.7, f"unexpected keep fraction {keep_frac}"

    # Narrow trailing dim exercises the lane-dense repack path (reshaped to (2,128)).
    x3 = jax.random.normal(jax.random.PRNGKey(1), (2, 4, 32), dtype=jnp.float32)
    y3 = dropout_forward(x3, p=p, seed=99)
    jax.block_until_ready(y3)
    assert y3.shape == x3.shape and y3.dtype == x3.dtype
    m3 = y3 != 0.0
    assert jnp.allclose(jnp.where(m3, y3, 0.0),
                        jnp.where(m3, x3 / (1.0 - p), 0.0), atol=1e-5)

    print("KERNEL_OK")
</pallas_src>

<mosaic_0001>
module attributes {stable_mosaic.version = 11 : i64} {
  func.func @_dropout_kernel(%arg0: i32, %arg1: memref<8x128xf32, #tpu.memory_space<vmem>>, %arg2: memref<8x128xi32, #tpu.memory_space<vmem>>, %arg3: memref<8x128xf32, #tpu.memory_space<vmem>>) attributes {dimension_semantics = [#tpu.dimension_semantics<parallel>], iteration_bounds = array<i64: 1>, scalar_prefetch = 0 : i64, scratch_operands = 0 : i64, tpu.core_type = #tpu.core_type<tc>, window_params = [{transform_indices = @transform_0, window_bounds = array<i64: 8, 128>}, {transform_indices = @transform_1, window_bounds = array<i64: 8, 128>}, {transform_indices = @transform_2, window_bounds = array<i64: 8, 128>}]} {
    %c0 = arith.constant 0 : index
    %c0_0 = arith.constant 0 : index
    %0 = vector.load %arg1[%c0, %c0_0] : memref<8x128xf32, #tpu.memory_space<vmem>>, vector<8x128xf32>
    %c0_1 = arith.constant 0 : index
    %c0_2 = arith.constant 0 : index
    %1 = vector.load %arg2[%c0_1, %c0_2] : memref<8x128xi32, #tpu.memory_space<vmem>>, vector<8x128xi32>
    %c-2147483648_i32 = arith.constant -2147483648 : i32
    %2 = vector.broadcast %c-2147483648_i32 : i32 to vector<8x128xi32>
    %3 = arith.cmpi uge, %1, %2 : vector<8x128xi32>
    %cst = arith.constant 2.000000e+00 : f32
    %cst_3 = arith.constant 0.000000e+00 : f32
    %4 = vector.broadcast %cst : f32 to vector<8x128xf32>
    %5 = vector.broadcast %cst_3 : f32 to vector<8x128xf32>
    %6 = arith.select %3, %4, %5 : vector<8x128xi1>, vector<8x128xf32>
    %7 = arith.mulf %0, %6 : vector<8x128xf32>
    %c0_4 = arith.constant 0 : index
    %c0_5 = arith.constant 0 : index
    %8 = vector.load %arg3[%c0_4, %c0_5] : memref<8x128xf32, #tpu.memory_space<vmem>>, vector<8x128xf32>
    tpu.vector_store %arg3[%c0_4, %c0_5], %7 {strides = array<i32>} : memref<8x128xf32, #tpu.memory_space<vmem>>, vector<8x128xf32>,
    return
  }
  func.func @transform_0(%arg0: i32) -> (i32, i32) {
    %c0_i32 = arith.constant 0 : i32
    %c0_i32_0 = arith.constant 0 : i32
    return %arg0, %c0_i32 : i32, i32
  }
  func.func @transform_1(%arg0: i32) -> (i32, i32) {
    %c0_i32 = arith.constant 0 : i32
    %c0_i32_0 = arith.constant 0 : i32
    return %arg0, %c0_i32 : i32, i32
  }
  func.func @transform_2(%arg0: i32) -> (i32, i32) {
    %c0_i32 = arith.constant 0 : i32
    %c0_i32_0 = arith.constant 0 : i32
    return %arg0, %c0_i32 : i32, i32
  }
}

</mosaic_0001>

<bundles_post_ra>
// kernel: tpu_custom_call.1
= control target key start
LH: loop header
LB: loop body
LE: loop exit
PB: predicated region body
PF: predicated region fallthrough
CT: control target
= control target key end

     0   :  { %7 = vsyncpa [#allocation3], 0  ;;  %s156_s0 = inlined_call_operand.hbm [shape: f32[8,128], index: 0, kind: input, shape index: {}]   ;;  %s157_s1 = inlined_call_operand.hbm [shape: u32[8,128], index: 1, kind: input, shape index: {}]   ;;  %s158_s2 = inlined_call_operand.hbm [shape: f32[8,128], index: 2, kind: output, shape index: {}]  }
   0x1   :  { %8 = vsyncpa [#allocation6], 0 }
   0x2   :  { %9 = vsyncpa [#allocation4], 0  ;;  %s128_s9 = smov [#allocation2]   ;;  %s129_s11 = smov [#allocation5]  }
   0x3   :  { %s16_s10 = sshll.u32 %s128_s9, 4  ;;  %s26_s12 = sshll.u32 %s129_s11, 4  ;;  %s17_s10 = int_to_ptr.vmem [resolvable:$true] %s16_s10  ;;  %s27_s12 = int_to_ptr.vmem [resolvable:$true] %s26_s12 }
   0x4   :  { %s70_s13 = scalar_lea.vmem %s17_s10, 128  ;;  %p75_p1 = scmp.lt.s32.totalorder %s17_s10, %s17_s10 }
   0x5   :  { %p71_p0 = scmp.ne.s32.totalorder %s17_s10, %s70_s13  ;;  %p76_p2 = scmp.lt.s32.totalorder %s70_s13, %s70_s13 }
   0x7   :  { %p77_p3 = por %p76_p2, %p75_p1 }
   0x9   :  { %p78_p4 = pnand %p77_p3, %p71_p0 }
   0xb   :  { %81 = shalt.err (!%p78_p4)
}
   0xc   :  { %19 = dma.hbm_to_vmem [thread:$0]  %s156_s0, 128, %s17_s10, [#allocation3]  }
   0xd   :  { %s90_s16 = scalar_lea.vmem %s27_s12, 128  ;;  %p95_p6 = scmp.lt.s32.totalorder %s27_s12, %s27_s12 }
   0xe   :  { %p91_p5 = scmp.ne.s32.totalorder %s27_s12, %s90_s16  ;;  %p96_p7 = scmp.lt.s32.totalorder %s90_s16, %s90_s16 }
  0x10   :  { %p97_p8 = por %p96_p7, %p95_p6 }
  0x12   :  { %p98_p9 = pnand %p97_p8, %p91_p5 }
  0x14   :  { %101 = shalt.err (!%p98_p9)
}
  0x15   :  { %29 = dma.hbm_to_vmem [thread:$0]  %s157_s1, 128, %s27_s12, [#allocation6]  }
  0x16   :  { %122 = dma.done.wait [#allocation3], 128  }
  0x17   :  { %123 = vsyncadd [#allocation3], 4294967168 }
  0x18   :  { %124 = dma.done.wait [#allocation6], 128  }
  0x19   :  { %125 = vsyncadd [#allocation6], 4294967168  ;;  %v36_v0 = vld [vmem:[#allocation2] sm:$0xff]  ;;  %v37_v1 = vld [vmem:[#allocation5] sm:$0xff]  ;;  %s130_s19 = smov [#allocation7]   ;;  %v131_v2 = vmov 0.0  }
  0x1a   :  { %s48_s20 = sshll.u32 %s130_s19, 4  ;;  %vm38_vm0 = vcmp.ge.u32.totalorder %v37_v1, 2147483648  ;;  %s49_s20 = int_to_ptr.vmem [resolvable:$true] %s48_s20 }
  0x1b   :  { %v39_v3 = vsel %vm38_vm0, 2.0, %v131_v2  ;;  %s102_s0 = scalar_lea.vmem %s49_s20, 128  ;;  %p107_p11 = scmp.lt.s32.totalorder %s49_s20, %s49_s20 }
  0x1c   :  { %v40_v4 = vmul.f32 %v39_v3, %v36_v0  ;;  %p103_p10 = scmp.ne.s32.totalorder %s49_s20, %s102_s0  ;;  %p108_p12 = scmp.lt.s32.totalorder %s102_s0, %s102_s0 }
  0x1e   :  { %41 = vst [vmem:[#allocation7] sm:$0xff] %v40_v4  ;;  %p109_p13 = por %p108_p12, %p107_p11 }
  0x20   :  { %p110_p0 = pnand %p109_p13, %p103_p10 }
  0x22   :  { %113 = shalt.err (!%p110_p0)
}
  0x23   :  { %51 = dma.vmem_to_hbm [thread:$0]  %s49_s20, 128, %s158_s2, [#allocation4]  }
  0x24   :  { %126 = dma.done.wait [#allocation4], 128  }
  0x25   :  { %127 = vsyncadd [#allocation4], 4294967168 }
  0x26   :  { %55 = vsyncpa [#allocation3], 1 }
  0x27   :  { %56 = vsyncpa [#allocation6], 1 }
  0x28   :  { %57 = vsyncpa [#allocation4], 1 }

</bundles_post_ra>
